<compile_context>
chip_gen: v7x
topology: tpu7x:2x2x1
jax: 0.10.0
libtpu: 0.0.40
codegen_flags: <defaults>
</compile_context>

<pallas_src>
import jax
import jax.numpy as jnp
from jax.experimental import pallas as pl
from jax.experimental.pallas import tpu as pltpu


def _round_up(x, m):
    return ((x + m - 1) // m) * m


def _round_down(x, m):
    return (x // m) * m


def _tpu_chip_params():
    """Best-effort (vmem_capacity_bytes, num_tensorcores) from the device kind."""
    try:
        kind = jax.devices()[0].device_kind.lower()
    except Exception:
        kind = ""
    if "v7" in kind:
        return 64 << 20, 2
    if "v6" in kind:
        return 128 << 20, 1
    if "v5e" in kind or "v5 lite" in kind or "v5lite" in kind:
        return 128 << 20, 1
    if "v5p" in kind or "v5" in kind:
        return 128 << 20, 2      # v5p megacore
    if "v4" in kind:
        return 128 << 20, 2      # v4 megacore
    return 64 << 20, 1           # unknown: conservative (v7x-sized)


def adapter_kernel(x_ref, wd_ref, bd_ref, wu_ref, bu_ref, o_ref):
    # x_ref:  (tm, D)   tile of flattened input rows (native dtype)
    # wd_ref: (D, A)    down-projection weight (whole, resident)
    # bd_ref: (1, A)    down-projection bias
    # wu_ref: (A, D)    up-projection weight (whole, resident)
    # bu_ref: (1, D)    up-projection bias
    x = x_ref[...]

    # down projection (MXU), f32 accumulate
    z = jnp.dot(x, wd_ref[...], preferred_element_type=jnp.float32)
    z = z + bd_ref[...].astype(jnp.float32)

    # activation (ReLU) in f32
    # TODO(synk): swap for jax.nn.gelu/silu if config.adapter_non_linearity differs
    z = jnp.maximum(z, 0.0)

    # up projection (MXU): feed in the weight's native dtype, f32 accumulate
    y = jnp.dot(z.astype(wu_ref.dtype), wu_ref[...],
                preferred_element_type=jnp.float32)
    y = y + bu_ref[...].astype(jnp.float32)

    # single cast on store
    o_ref[...] = y.astype(o_ref.dtype)


def adapter_forward(x, w_down, b_down, w_up, b_up, *, tm=None):
    """x: (B, S, D). w_down: (D, A), w_up: (A, D), biases (1, A)/(1, D). Returns (B, S, D)."""
    B, S, D = x.shape
    A = w_down.shape[1]
    M = B * S

    # free reshapes only -- no padding, no copies, no output slice
    x2 = x.reshape(M, D)
    bd = jnp.reshape(b_down, (1, A))
    bu = jnp.reshape(b_up, (1, D))

    x_item = jnp.dtype(x.dtype).itemsize
    w_item = jnp.dtype(w_down.dtype).itemsize
    b_item = max(jnp.dtype(b_down.dtype).itemsize, jnp.dtype(b_up.dtype).itemsize)
    # sublane granularity for the streamed row axis (weights use full-dim blocks, so
    # only x/out dtype matters here)
    sub = 8 if x_item >= 4 else 16

    vmem_cap, num_tc = _tpu_chip_params()
    headroom = 16 << 20

    # resident weight/bias footprint; budget for the worst case (double-buffered),
    # so the fallback path is guaranteed to fit whenever the fast path does.
    weight_bytes = 2 * (D * A + A * D) * w_item + 2 * (A + D) * b_item

    # ---- row tile selection: as big as the VMEM budget allows ----------------------
    if tm is None:
        stream_row_bytes = 2 * 2 * D * x_item          # x + out tiles, double-buffered
        scratch_row_bytes = 4 * (A + D)                # f32 intermediates z and y
        avail = vmem_cap - headroom - weight_bytes
        tm_vmem = max(sub, _round_down(
            max(avail, 0) // max(stream_row_bytes + scratch_row_bytes, 1), sub))
        tm_target = max(512, _round_down((2 << 20) // max(D * x_item, 1), sub))
        tm = min(2048, tm_target, tm_vmem, _round_up(M, sub))
        tm = max(tm, sub)
        # make the "parallel" row axis have >=2 steps on 2-TensorCore chips
        if num_tc >= 2 and M > 2 * sub and pl.cdiv(M, tm) < 2:
            tm = _round_up(pl.cdiv(M, 2), sub)
    grid_m = pl.cdiv(M, tm)

    # ---- explicit VMEM budget: derived from the footprint, headroom reserved --------
    stream_bytes = 2 * tm * D * x_item * 2
    scratch_bytes = 4 * tm * (A + D)
    need = weight_bytes + stream_bytes + scratch_bytes
    vmem_limit = int(min(max(2 * need, 32 << 20), vmem_cap - headroom))

    x_spec = pl.BlockSpec((tm, D), lambda i: (i, 0))
    o_spec = pl.BlockSpec((tm, D), lambda i: (i, 0))

    def _weight_specs(single_buffered):
        # Constant index_map => the operands are resident across the whole grid;
        # Buffered(1) avoids pointlessly double-buffering them (halves weight VMEM).
        kw = dict(pipeline_mode=pl.Buffered(1)) if single_buffered else {}
        return [
            pl.BlockSpec((D, A), lambda i: (0, 0), **kw),   # w_down
            pl.BlockSpec((1, A), lambda i: (0, 0), **kw),   # b_down
            pl.BlockSpec((A, D), lambda i: (0, 0), **kw),   # w_up
            pl.BlockSpec((1, D), lambda i: (0, 0), **kw),   # b_up
        ]

    def _run(single_buffered):
        call = pl.pallas_call(
            adapter_kernel,
            out_shape=jax.ShapeDtypeStruct((M, D), x.dtype),
            grid_spec=pltpu.PrefetchScalarGridSpec(
                num_scalar_prefetch=0,
                grid=(grid_m,),
                in_specs=[x_spec] + _weight_specs(single_buffered),
                out_specs=o_spec,
            ),
            compiler_params=pltpu.CompilerParams(
                dimension_semantics=("parallel",),
                vmem_limit_bytes=vmem_limit,
            ),
        )
        out = call(x2, w_down, bd, w_up, bu)
        return jax.block_until_ready(out)

    try:
        out = _run(True)
    except Exception:
        # pipeline_mode=pl.Buffered(1) rejected by this JAX/Mosaic build -> fall back
        # to the default double-buffered resident weights (correctness identical).
        out = _run(False)

    return out.reshape(B, S, D)


def reference_forward(x, w_down, b_down, w_up, b_up):
    z = jnp.einsum("bsd,da->bsa", x, w_down) + jnp.reshape(b_down, (-1,))
    z = jnp.maximum(z, 0.0)
    return jnp.einsum("bsa,ad->bsd", z, w_up) + jnp.reshape(b_up, (-1,))


if __name__ == "__main__":
    # config: input_dim=32, adapter_dim=16, weight_init_range=1e-2, non_linearity="relu"
    input_dim = 32
    adapter_dim = 16
    weight_init_range = 1e-2
    B, S = 2, 8

    key = jax.random.PRNGKey(0)
    kx, kwd, kwu = jax.random.split(key, 3)

    x = jax.random.normal(kx, (B, S, input_dim), dtype=jnp.float32)
    # linear_layer(in, out, std): weight ~ N(0, std), bias = 0 (deterministic synthetic init)
    w_down = (jax.random.normal(kwd, (input_dim, adapter_dim), dtype=jnp.float32)
              * weight_init_range)
    b_down = jnp.zeros((1, adapter_dim), dtype=jnp.float32)
    w_up = (jax.random.normal(kwu, (adapter_dim, input_dim), dtype=jnp.float32)
            * weight_init_range)
    b_up = jnp.zeros((1, input_dim), dtype=jnp.float32)

    y = jax.block_until_ready(adapter_forward(x, w_down, b_down, w_up, b_up))
    y_ref = reference_forward(x, w_down, b_down, w_up, b_up)
    assert y.shape == (B, S, input_dim)
    assert jnp.allclose(y, y_ref, atol=1e-5, rtol=1e-5), "mismatch vs reference (small)"

    # second check: multi-row grid, lane-dense D (the copy-free fast path), f32
    B2, S2, D2, A2 = 4, 96, 256, 64
    k2x, k2wd, k2wu = jax.random.split(jax.random.PRNGKey(0), 3)
    x2 = jax.random.normal(k2x, (B2, S2, D2), dtype=jnp.float32)
    wd2 = jax.random.normal(k2wd, (D2, A2), dtype=jnp.float32) * weight_init_range
    bd2 = jnp.zeros((1, A2), dtype=jnp.float32)
    wu2 = jax.random.normal(k2wu, (A2, D2), dtype=jnp.float32) * weight_init_range
    bu2 = jnp.zeros((1, D2), dtype=jnp.float32)

    y2 = jax.block_until_ready(adapter_forward(x2, wd2, bd2, wu2, bu2))
    y2_ref = reference_forward(x2, wd2, bd2, wu2, bu2)
    assert y2.shape == (B2, S2, D2)
    assert jnp.allclose(y2, y2_ref, atol=1e-4, rtol=1e-4), "mismatch vs reference (large)"

    # third check: bf16 end-to-end (halves streamed HBM bytes); f32 accumulation inside,
    # only mixed-precision step is the z->bf16 cast before the up-projection.
    xb = x2.astype(jnp.bfloat16)
    wdb, bdb = wd2.astype(jnp.bfloat16), bd2.astype(jnp.bfloat16)
    wub, bub = wu2.astype(jnp.bfloat16), bu2.astype(jnp.bfloat16)
    y3 = jax.block_until_ready(adapter_forward(xb, wdb, bdb, wub, bub))
    y3_ref = reference_forward(xb.astype(jnp.float32), wdb.astype(jnp.float32),
                               bdb.astype(jnp.float32), wub.astype(jnp.float32),
                               bub.astype(jnp.float32))
    assert y3.dtype == jnp.bfloat16 and y3.shape == (B2, S2, D2)
    assert jnp.allclose(y3.astype(jnp.float32), y3_ref, atol=2e-3, rtol=5e-2), \
        "mismatch vs reference (bf16)"

    print("KERNEL_OK")
</pallas_src>

<mosaic_0001>
module attributes {stable_mosaic.version = 11 : i64} {
  func.func @adapter_kernel(%arg0: i32, %arg1: memref<16x32xf32, #tpu.memory_space<vmem>>, %arg2: memref<32x16xf32, #tpu.memory_space<vmem>>, %arg3: memref<1x16xf32, #tpu.memory_space<vmem>>, %arg4: memref<16x32xf32, #tpu.memory_space<vmem>>, %arg5: memref<1x32xf32, #tpu.memory_space<vmem>>, %arg6: memref<16x32xf32, #tpu.memory_space<vmem>>) attributes {dimension_semantics = [#tpu.dimension_semantics<parallel>], iteration_bounds = array<i64: 1>, scalar_prefetch = 0 : i64, scratch_operands = 0 : i64, tpu.core_type = #tpu.core_type<tc>, window_params = [{transform_indices = @transform_0, window_bounds = array<i64: 16, 32>}, {pipeline_mode = #tpu.pipeline_mode<synchronous>, transform_indices = @transform_1, window_bounds = array<i64: 32, 16>}, {pipeline_mode = #tpu.pipeline_mode<synchronous>, transform_indices = @transform_2, window_bounds = array<i64: 1, 16>}, {pipeline_mode = #tpu.pipeline_mode<synchronous>, transform_indices = @transform_3, window_bounds = array<i64: 16, 32>}, {pipeline_mode = #tpu.pipeline_mode<synchronous>, transform_indices = @transform_4, window_bounds = array<i64: 1, 32>}, {transform_indices = @transform_5, window_bounds = array<i64: 16, 32>}]} {
    %c0 = arith.constant 0 : index
    %c0_0 = arith.constant 0 : index
    %0 = vector.load %arg1[%c0, %c0_0] : memref<16x32xf32, #tpu.memory_space<vmem>>, vector<16x32xf32>
    %c0_1 = arith.constant 0 : index
    %c0_2 = arith.constant 0 : index
    %1 = vector.load %arg2[%c0_1, %c0_2] : memref<32x16xf32, #tpu.memory_space<vmem>>, vector<32x16xf32>
    %cst = arith.constant dense<0.000000e+00> : vector<16x16xf32>
    %2 = tpu.matmul %0, %1, %cst {dimension_numbers = #tpu.dot_dimension_numbers<[1], [0], [0], [1], [0, 0, 1, 1], [], []>} : vector<16x32xf32>, vector<32x16xf32>, vector<16x16xf32> -> vector<16x16xf32>
    %c0_3 = arith.constant 0 : index
    %c0_4 = arith.constant 0 : index
    %3 = vector.load %arg3[%c0_3, %c0_4] : memref<1x16xf32, #tpu.memory_space<vmem>>, vector<1x16xf32>
    %4 = vector.broadcast %3 : vector<1x16xf32> to vector<16x16xf32>
    %5 = arith.addf %2, %4 : vector<16x16xf32>
    %cst_5 = arith.constant 0.000000e+00 : f32
    %6 = vector.broadcast %cst_5 : f32 to vector<16x16xf32>
    %7 = arith.maximumf %5, %6 : vector<16x16xf32>
    %c0_6 = arith.constant 0 : index
    %c0_7 = arith.constant 0 : index
    %8 = vector.load %arg4[%c0_6, %c0_7] : memref<16x32xf32, #tpu.memory_space<vmem>>, vector<16x32xf32>
    %cst_8 = arith.constant dense<0.000000e+00> : vector<16x32xf32>
    %9 = tpu.matmul %7, %8, %cst_8 {dimension_numbers = #tpu.dot_dimension_numbers<[1], [0], [0], [1], [0, 0, 1, 1], [], []>} : vector<16x16xf32>, vector<16x32xf32>, vector<16x32xf32> -> vector<16x32xf32>
    %c0_9 = arith.constant 0 : index
    %c0_10 = arith.constant 0 : index
    %10 = vector.load %arg5[%c0_9, %c0_10] : memref<1x32xf32, #tpu.memory_space<vmem>>, vector<1x32xf32>
    %11 = vector.broadcast %10 : vector<1x32xf32> to vector<16x32xf32>
    %12 = arith.addf %9, %11 : vector<16x32xf32>
    %c0_11 = arith.constant 0 : index
    %c0_12 = arith.constant 0 : index
    %13 = vector.load %arg6[%c0_11, %c0_12] : memref<16x32xf32, #tpu.memory_space<vmem>>, vector<16x32xf32>
    tpu.vector_store %arg6[%c0_11, %c0_12], %12 {strides = array<i32>} : memref<16x32xf32, #tpu.memory_space<vmem>>, vector<16x32xf32>,
    return
  }
  func.func @transform_0(%arg0: i32) -> (i32, i32) {
    %c0_i32 = arith.constant 0 : i32
    %c0_i32_0 = arith.constant 0 : i32
    return %arg0, %c0_i32 : i32, i32
  }
  func.func @transform_1(%arg0: i32) -> (i32, i32) {
    %c0_i32 = arith.constant 0 : i32
    %c0_i32_0 = arith.constant 0 : i32
    %c0_i32_1 = arith.constant 0 : i32
    return %c0_i32, %c0_i32_0 : i32, i32
  }
  func.func @transform_2(%arg0: i32) -> (i32, i32) {
    %c0_i32 = arith.constant 0 : i32
    %c0_i32_0 = arith.constant 0 : i32
    %c0_i32_1 = arith.constant 0 : i32
    return %c0_i32, %c0_i32_0 : i32, i32
  }
  func.func @transform_3(%arg0: i32) -> (i32, i32) {
    %c0_i32 = arith.constant 0 : i32
    %c0_i32_0 = arith.constant 0 : i32
    %c0_i32_1 = arith.constant 0 : i32
    return %c0_i32, %c0_i32_0 : i32, i32
  }
  func.func @transform_4(%arg0: i32) -> (i32, i32) {
    %c0_i32 = arith.constant 0 : i32
    %c0_i32_0 = arith.constant 0 : i32
    %c0_i32_1 = arith.constant 0 : i32
    return %c0_i32, %c0_i32_0 : i32, i32
  }
  func.func @transform_5(%arg0: i32) -> (i32, i32) {
    %c0_i32 = arith.constant 0 : i32
    %c0_i32_0 = arith.constant 0 : i32
    return %arg0, %c0_i32 : i32, i32
  }
}

module attributes {stable_mosaic.version = 11 : i64} {
  func.func @adapter_kernel(%arg0: i32, %arg1: memref<16x32xf32, #tpu.memory_space<vmem>>, %arg2: memref<32x16xf32, #tpu.memory_space<vmem>>, %arg3: memref<1x16xf32, #tpu.memory_space<vmem>>, %arg4: memref<16x32xf32, #tpu.memory_space<vmem>>, %arg5: memref<1x32xf32, #tpu.memory_space<vmem>>, %arg6: memref<16x32xf32, #tpu.memory_space<vmem>>) attributes {dimension_semantics = [#tpu.dimension_semantics<parallel>], iteration_bounds = array<i64: 1>, scalar_prefetch = 0 : i64, scratch_operands = 0 : i64, tpu.core_type = #tpu.core_type<tc>, window_params = [{transform_indices = @transform_0, window_bounds = array<i64: 16, 32>}, {pipeline_mode = #tpu.pipeline_mode<synchronous>, transform_indices = @transform_1, window_bounds = array<i64: 32, 16>}, {pipeline_mode = #tpu.pipeline_mode<synchronous>, transform_indices = @transform_2, window_bounds = array<i64: 1, 16>}, {pipeline_mode = #tpu.pipeline_mode<synchronous>, transform_indices = @transform_3, window_bounds = array<i64: 16, 32>}, {pipeline_mode = #tpu.pipeline_mode<synchronous>, transform_indices = @transform_4, window_bounds = array<i64: 1, 32>}, {transform_indices = @transform_5, window_bounds = array<i64: 16, 32>}]} {
    %c0 = arith.constant 0 : index
    %c0_0 = arith.constant 0 : index
    %0 = vector.load %arg1[%c0, %c0_0] : memref<16x32xf32, #tpu.memory_space<vmem>>, vector<16x32xf32>
    %c0_1 = arith.constant 0 : index
    %c0_2 = arith.constant 0 : index
    %1 = vector.load %arg2[%c0_1, %c0_2] : memref<32x16xf32, #tpu.memory_space<vmem>>, vector<32x16xf32>
    %cst = arith.constant dense<0.000000e+00> : vector<16x16xf32>
    %2 = tpu.matmul %0, %1, %cst {dimension_numbers = #tpu.dot_dimension_numbers<[1], [0], [0], [1], [0, 0, 1, 1], [], []>} : vector<16x32xf32>, vector<32x16xf32>, vector<16x16xf32> -> vector<16x16xf32>
    %c0_3 = arith.constant 0 : index
    %c0_4 = arith.constant 0 : index
    %3 = vector.load %arg3[%c0_3, %c0_4] : memref<1x16xf32, #tpu.memory_space<vmem>>, vector<1x16xf32>
    %4 = vector.broadcast %3 : vector<1x16xf32> to vector<16x16xf32>
    %5 = arith.addf %2, %4 : vector<16x16xf32>
    %cst_5 = arith.constant 0.000000e+00 : f32
    %6 = vector.broadcast %cst_5 : f32 to vector<16x16xf32>
    %7 = arith.maximumf %5, %6 : vector<16x16xf32>
    %c0_6 = arith.constant 0 : index
    %c0_7 = arith.constant 0 : index
    %8 = vector.load %arg4[%c0_6, %c0_7] : memref<16x32xf32, #tpu.memory_space<vmem>>, vector<16x32xf32>
    %cst_8 = arith.constant dense<0.000000e+00> : vector<16x32xf32>
    %9 = tpu.matmul %7, %8, %cst_8 {dimension_numbers = #tpu.dot_dimension_numbers<[1], [0], [0], [1], [0, 0, 1, 1], [], []>} : vector<16x16xf32>, vector<16x32xf32>, vector<16x32xf32> -> vector<16x32xf32>
    %c0_9 = arith.constant 0 : index
    %c0_10 = arith.constant 0 : index
    %10 = vector.load %arg5[%c0_9, %c0_10] : memref<1x32xf32, #tpu.memory_space<vmem>>, vector<1x32xf32>
    %11 = vector.broadcast %10 : vector<1x32xf32> to vector<16x32xf32>
    %12 = arith.addf %9, %11 : vector<16x32xf32>
    %c0_11 = arith.constant 0 : index
    %c0_12 = arith.constant 0 : index
    %13 = vector.load %arg6[%c0_11, %c0_12] : memref<16x32xf32, #tpu.memory_space<vmem>>, vector<16x32xf32>
    tpu.vector_store %arg6[%c0_11, %c0_12], %12 {strides = array<i32>} : memref<16x32xf32, #tpu.memory_space<vmem>>, vector<16x32xf32>,
    return
  }
  func.func @transform_0(%arg0: i32) -> (i32, i32) {
    %c0_i32 = arith.constant 0 : i32
    %c0_i32_0 = arith.constant 0 : i32
    return %arg0, %c0_i32 : i32, i32
  }
  func.func @transform_1(%arg0: i32) -> (i32, i32) {
    %c0_i32 = arith.constant 0 : i32
    %c0_i32_0 = arith.constant 0 : i32
    %c0_i32_1 = arith.constant 0 : i32
    return %c0_i32, %c0_i32_0 : i32, i32
  }
  func.func @transform_2(%arg0: i32) -> (i32, i32) {
    %c0_i32 = arith.constant 0 : i32
    %c0_i32_0 = arith.constant 0 : i32
    %c0_i32_1 = arith.constant 0 : i32
    return %c0_i32, %c0_i32_0 : i32, i32
  }
  func.func @transform_3(%arg0: i32) -> (i32, i32) {
    %c0_i32 = arith.constant 0 : i32
    %c0_i32_0 = arith.constant 0 : i32
    %c0_i32_1 = arith.constant 0 : i32
    return %c0_i32, %c0_i32_0 : i32, i32
  }
  func.func @transform_4(%arg0: i32) -> (i32, i32) {
    %c0_i32 = arith.constant 0 : i32
    %c0_i32_0 = arith.constant 0 : i32
    %c0_i32_1 = arith.constant 0 : i32
    return %c0_i32, %c0_i32_0 : i32, i32
  }
  func.func @transform_5(%arg0: i32) -> (i32, i32) {
    %c0_i32 = arith.constant 0 : i32
    %c0_i32_0 = arith.constant 0 : i32
    return %arg0, %c0_i32 : i32, i32
  }
}

</mosaic_0001>

<bundles_post_ra>
// kernel: tpu_custom_call.1
= control target key start
LH: loop header
LB: loop body
LE: loop exit
PB: predicated region body
PF: predicated region fallthrough
CT: control target
= control target key end

     0   :  { %vm34_vm0 = vcmask 261120   ;;  %s379_s0 = inlined_call_operand.vmem [shape: f32[16,32], index: 0, kind: input, shape index: {}]   ;;  %s380_s1 = inlined_call_operand.vmem [shape: f32[32,16], index: 1, kind: input, shape index: {}]   ;;  %s381_s2 = inlined_call_operand.vmem [shape: f32[1,16], index: 2, kind: input, shape index: {}]   ;;  %s382_s3 = inlined_call_operand.vmem [shape: f32[16,32], index: 3, kind: input, shape index: {}]   ;;  %s383_s4 = inlined_call_operand.vmem [shape: f32[1,32], index: 4, kind: input, shape index: {}]   ;;  %s384_s5 = inlined_call_operand.hbm [shape: f32[16,32], index: 5, kind: output, shape index: {}]  }
   0x1   :  { %v23_v0 = vld [vmem:[%s380_s1] sm:$0xff]  ;;  %v24_v1 = vld [vmem:[%s380_s1 + $0x8] sm:$0xff]  ;;  %v25_v2 = vld [vmem:[%s380_s1 + $0x10] sm:$0xff] }
   0x2   :  { %v261_v3 = vpack.c.bf16 %v24_v1, %v23_v0  ;;  %v26_v4 = vld [vmem:[%s380_s1 + $0x18] sm:$0xff]  ;;  %v21_v5 = vld [vmem:[%s379_s0] sm:$0xff] }
   0x3   :  { %v265_v6 = vpack.c.bf16 %v26_v4, %v25_v2  ;;  %251 = vmatprep.mubr.msk.f32.mxu0 %vm34_vm0, %v21_v5 }
   0x4   :  { %10 = vsyncpa [#allocation3], 0  ;;  %262 = vmatprep.subr.bf16.mxu0 %v261_v3  ;;  %v22_v7 = vld [vmem:[%s379_s0 + $0x8] sm:$0xff]  ;;  %v118_v8 = vld [vmem:[%s382_s3] sm:$0xff]  ;;  %vm127_vm1 = vcmask 130048  }
   0x5   :  { %264 = vmatpush3.bf16.msra.mxu0 %v261_v3  ;;  %v119_v9 = vld [vmem:[%s382_s3 + $0x8] sm:$0xff]  ;;  %v227_v11 = vld [vmem:[%s381_s2] ss:$0 sm:$0xff]  ;;  %s300_s3 = smov [#allocation2]  }
   0x6   :  { %266 = vmatprep.subr.bf16.mxu0 %v265_v6  ;;  %v269_v10 = vpack.c.bf16 %v119_v9, %v118_v8  ;;  %v230_v18 = vld [vmem:[%s383_s4] ss:$0 sm:$0xff]  ;;  %s216_s11 = sshll.u32 %s300_s3, 4  ;;  %s217_s11 = int_to_ptr.vmem [resolvable:$true] %s216_s11 }
   0x7   :  { %s276_s2 = scalar_lea.vmem %s217_s11, 256  ;;  %p281_p1 = scmp.lt.s32.totalorder %s217_s11, %s217_s11 }
   0x8   :  { %270 = vmatprep.subr.bf16.mxu1 %v269_v10  ;;  %p277_p0 = scmp.ne.s32.totalorder %s217_s11, %s276_s2  ;;  %p282_p2 = scmp.lt.s32.totalorder %s276_s2, %s276_s2 }
   0x9   :  { %268 = vmatpush3.bf16.msra.mxu0 %v265_v6  ;;  %272 = vmatpush3.bf16.msra.mxu1 %v269_v10 }
   0xa   :  { %p283_p3 = por %p282_p2, %p281_p1 }
   0xc   :  { %252 = vmatmul.mubr.msk.f32.vlgmr.msra.gmra.mrb[0].mxu0 %vm34_vm0, %v22_v7  ;;  %p284_p4 = pnand %p283_p3, %p277_p0 }
  0xdf   :  { %v253_v12 = vpop.f32.mrb[0].mxu0 }
  0xe0   :  { %v113_v13 = vadd.f32 %v253_v12, %v227_v11  ;;  %v107_v14 = vpop.f32.mrb[1].mxu0 }
  0xe1   :  { %v108_v15 = vadd.f32 %v227_v11, %v107_v14 }
  0xe2   :  { %v117_v17 = vmax.f32 %v113_v13, 0.0 }
  0xe3   :  { %v116_v16 = vmax.f32 %v108_v15, 0.0 }
  0xe5   :  { %258 = vmatprep.mubr.msk.f32.mxu1 %vm127_vm1, %v116_v16 }
  0xe6   :  { %259 = vmatmul.mubr.msk.f32.vlgmr.msra.gmra.mrb[0].mxu1 %vm127_vm1, %v117_v17 }
 0x1b9   :  { %v260_v19 = vpop.f32.mrb[0].mxu1 }
 0x1ba   :  { %v206_v20 = vadd.f32 %v260_v19, %v230_v18  ;;  %v200_v21 = vpop.f32.mrb[1].mxu1 }
 0x1bb   :  { %v201_v22 = vadd.f32 %v230_v18, %v200_v21 }
 0x1bc   :  { %210 = vst.msk [vmem:[#allocation2 + $0x8] sm:$0xff] %vm34_vm0, %v206_v20 }
 0x1bd   :  { %209 = vst.msk [vmem:[#allocation2] sm:$0xff] %vm34_vm0, %v201_v22 }
 0x1be   :  { %287 = shalt.err (!%p284_p4)
}
 0x1bf   :  { %s288_s13 = scalar_lea.hbm %s384_s5, 256 }
 0x1c0   :  { %p289_p5 = scmp.ne.s32.totalorder %s384_s5, %s288_s13  ;;  %p292_p6 = scmp.lt.u32.totalorder %s288_s13, %s384_s5 }
 0x1c2   :  { %p294_p7 = pnand %p292_p6, %p289_p5 }
 0x1c4   :  { %297 = shalt.err (!%p294_p7)
}
 0x1c5   :  { %s301_s18 = smov 128   ;;  %s302_s19 = smov 8  }
 0x1c6   :  { %222 = dma.vmem_to_hbm [thread:$0]  %s217_s11, 256, %s384_s5, [#allocation3], %s301_s18, %s301_s18, %s302_s19  }
 0x1c7   :  { %298 = dma.done.wait [#allocation3], 256  }
 0x1c8   :  { %299 = vsyncadd [#allocation3], 4294967040 }
 0x1c9   :  { %226 = vsyncpa [#allocation3], 1 }

// kernel: tpu_custom_call.1
= control target key start
LH: loop header
LB: loop body
LE: loop exit
PB: predicated region body
PF: predicated region fallthrough
CT: control target
= control target key end

     0   :  { %vm34_vm0 = vcmask 261120   ;;  %s379_s0 = inlined_call_operand.vmem [shape: f32[16,32], index: 0, kind: input, shape index: {}]   ;;  %s380_s1 = inlined_call_operand.vmem [shape: f32[32,16], index: 1, kind: input, shape index: {}]   ;;  %s381_s2 = inlined_call_operand.vmem [shape: f32[1,16], index: 2, kind: input, shape index: {}]   ;;  %s382_s3 = inlined_call_operand.vmem [shape: f32[16,32], index: 3, kind: input, shape index: {}]   ;;  %s383_s4 = inlined_call_operand.vmem [shape: f32[1,32], index: 4, kind: input, shape index: {}]   ;;  %s384_s5 = inlined_call_operand.hbm [shape: f32[16,32], index: 5, kind: output, shape index: {}]  }
   0x1   :  { %v23_v0 = vld [vmem:[%s380_s1] sm:$0xff]  ;;  %v24_v1 = vld [vmem:[%s380_s1 + $0x8] sm:$0xff]  ;;  %v25_v2 = vld [vmem:[%s380_s1 + $0x10] sm:$0xff] }
   0x2   :  { %v261_v3 = vpack.c.bf16 %v24_v1, %v23_v0  ;;  %v26_v4 = vld [vmem:[%s380_s1 + $0x18] sm:$0xff]  ;;  %v21_v5 = vld [vmem:[%s379_s0] sm:$0xff] }
   0x3   :  { %v265_v6 = vpack.c.bf16 %v26_v4, %v25_v2  ;;  %251 = vmatprep.mubr.msk.f32.mxu0 %vm34_vm0, %v21_v5 }
   0x4   :  { %10 = vsyncpa [#allocation3], 0  ;;  %262 = vmatprep.subr.bf16.mxu0 %v261_v3  ;;  %v22_v7 = vld [vmem:[%s379_s0 + $0x8] sm:$0xff]  ;;  %v118_v8 = vld [vmem:[%s382_s3] sm:$0xff]  ;;  %vm127_vm1 = vcmask 130048  }
   0x5   :  { %264 = vmatpush3.bf16.msra.mxu0 %v261_v3  ;;  %v119_v9 = vld [vmem:[%s382_s3 + $0x8] sm:$0xff]  ;;  %v227_v11 = vld [vmem:[%s381_s2] ss:$0 sm:$0xff]  ;;  %s300_s3 = smov [#allocation2]  }
   0x6   :  { %266 = vmatprep.subr.bf16.mxu0 %v265_v6  ;;  %v269_v10 = vpack.c.bf16 %v119_v9, %v118_v8  ;;  %v230_v18 = vld [vmem:[%s383_s4] ss:$0 sm:$0xff]  ;;  %s216_s11 = sshll.u32 %s300_s3, 4  ;;  %s217_s11 = int_to_ptr.vmem [resolvable:$true] %s216_s11 }
   0x7   :  { %s276_s2 = scalar_lea.vmem %s217_s11, 256  ;;  %p281_p1 = scmp.lt.s32.totalorder %s217_s11, %s217_s11 }
   0x8   :  { %270 = vmatprep.subr.bf16.mxu1 %v269_v10  ;;  %p277_p0 = scmp.ne.s32.totalorder %s217_s11, %s276_s2  ;;  %p282_p2 = scmp.lt.s32.totalorder %s276_s2, %s276_s2 }
   0x9   :  { %268 = vmatpush3.bf16.msra.mxu0 %v265_v6  ;;  %272 = vmatpush3.bf16.msra.mxu1 %v269_v10 }
   0xa   :  { %p283_p3 = por %p282_p2, %p281_p1 }
   0xc   :  { %252 = vmatmul.mubr.msk.f32.vlgmr.msra.gmra.mrb[0].mxu0 %vm34_vm0, %v22_v7  ;;  %p284_p4 = pnand %p283_p3, %p277_p0 }
  0xdf   :  { %v253_v12 = vpop.f32.mrb[0].mxu0 }
  0xe0   :  { %v113_v13 = vadd.f32 %v253_v12, %v227_v11  ;;  %v107_v14 = vpop.f32.mrb[1].mxu0 }
  0xe1   :  { %v108_v15 = vadd.f32 %v227_v11, %v107_v14 }
  0xe2   :  { %v117_v17 = vmax.f32 %v113_v13, 0.0 }
  0xe3   :  { %v116_v16 = vmax.f32 %v108_v15, 0.0 }
  0xe5   :  { %258 = vmatprep.mubr.msk.f32.mxu1 %vm127_vm1, %v116_v16 }
  0xe6   :  { %259 = vmatmul.mubr.msk.f32.vlgmr.msra.gmra.mrb[0].mxu1 %vm127_vm1, %v117_v17 }
 0x1b9   :  { %v260_v19 = vpop.f32.mrb[0].mxu1 }
 0x1ba   :  { %v206_v20 = vadd.f32 %v260_v19, %v230_v18  ;;  %v200_v21 = vpop.f32.mrb[1].mxu1 }
 0x1bb   :  { %v201_v22 = vadd.f32 %v230_v18, %v200_v21 }
 0x1bc   :  { %210 = vst.msk [vmem:[#allocation2 + $0x8] sm:$0xff] %vm34_vm0, %v206_v20 }
 0x1bd   :  { %209 = vst.msk [vmem:[#allocation2] sm:$0xff] %vm34_vm0, %v201_v22 }
 0x1be   :  { %287 = shalt.err (!%p284_p4)
}
 0x1bf   :  { %s288_s13 = scalar_lea.hbm %s384_s5, 256 }
 0x1c0   :  { %p289_p5 = scmp.ne.s32.totalorder %s384_s5, %s288_s13  ;;  %p292_p6 = scmp.lt.u32.totalorder %s288_s13, %s384_s5 }
 0x1c2   :  { %p294_p7 = pnand %p292_p6, %p289_p5 }
 0x1c4   :  { %297 = shalt.err (!%p294_p7)
}
 0x1c5   :  { %s301_s18 = smov 128   ;;  %s302_s19 = smov 8  }
 0x1c6   :  { %222 = dma.vmem_to_hbm [thread:$0]  %s217_s11, 256, %s384_s5, [#allocation3], %s301_s18, %s301_s18, %s302_s19  }
 0x1c7   :  { %298 = dma.done.wait [#allocation3], 256  }
 0x1c8   :  { %299 = vsyncadd [#allocation3], 4294967040 }
 0x1c9   :  { %226 = vsyncpa [#allocation3], 1 }

</bundles_post_ra>
